<compile_context>
chip_gen: v7x
topology: tpu7x:2x2x1
jax: 0.10.0
libtpu: 0.0.40
codegen_flags: <defaults>
</compile_context>

<pallas_src>
import functools
import numpy as np

import jax
import jax.numpy as jnp
from jax import lax
from jax.experimental import pallas as pl
from jax.experimental.pallas import tpu as pltpu


def _round_up(x, m):
    return (x + m - 1) // m * m


# ---------------------------------------------------------------------------
# Kernel 1: edge phase — online scatter-softmax + attention-weighted scatter-add.
# Output node_agg is written in transposed layout [F_pad, N_pad] (bf16); lane/row
# `f_dim` of the padded feature axis carries the softmax denominator internally.
# ---------------------------------------------------------------------------
def _edge_kernel(edge_ref, idx_ref, emb_ref, agg_ref, m_sc, acc_sc, *,
                 n_pad, f_dim, inv_scale):
    i = pl.program_id(0)
    te = edge_ref.shape[0]

    @pl.when(i == 0)
    def _init():
        m_sc[...] = jnp.full_like(m_sc, -1e30)
        acc_sc[...] = jnp.zeros_like(acc_sc)

    edge = edge_ref[...]                                   # [TE, Fp] bf16 (lane f_dim == 1.0)
    idx = idx_ref[...]                                     # [TE, 1] int32 (pad rows -> n_pad)
    lanes = lax.broadcasted_iota(jnp.int32, (te, n_pad), 1)
    cmp = idx == lanes                                     # [TE, Np] bool
    onehot = cmp.astype(jnp.bfloat16)                      # exact 0/1 in bf16

    # gather node_embedding[outdegree] on the MXU
    emb_g = jnp.dot(onehot, emb_ref[...], preferred_element_type=jnp.float32)   # [TE, Fp] f32
    src = jnp.sum(edge * emb_g, axis=1, keepdims=True) * inv_scale              # [TE, 1]  f32

    # online segment max (per node), flash-attention style
    masked = jnp.where(cmp, src, jnp.float32(-1e30))        # [TE, Np]
    m_old = m_sc[...]                                       # [1, Np]
    m_new = jnp.maximum(m_old, jnp.max(masked, axis=0, keepdims=True))
    alpha = jnp.exp(m_old - m_new)                          # [1, Np] rescale factor
    m_sc[...] = m_new

    # exact per-edge exp(src - m_new[seg]) recovered from the masked matrix
    base = jnp.where(m_new > jnp.float32(-1e29), m_new, 0.0)
    t = jnp.max(masked - base, axis=1, keepdims=True)       # [TE, 1]
    e = jnp.exp(jnp.minimum(t, 0.0))                        # [TE, 1]

    # scatter-add of exp-weighted edges; the reserved ones-lane (index f_dim) makes the
    # same matmul also accumulate the softmax denominator (row f_dim of the accumulator).
    weighted = (edge * e).astype(jnp.bfloat16)               # [TE, Fp]
    contrib = lax.dot_general(weighted, onehot, (((0,), (0,)), ((), ())),
                              preferred_element_type=jnp.float32)   # [Fp, Np]
    acc_sc[...] = acc_sc[...] * alpha + contrib

    @pl.when(i == pl.num_programs(0) - 1)
    def _finalize():
        den = acc_sc[f_dim:f_dim + 1, :]                     # [1, Np] softmax denominators
        inv = jnp.where(den > 0.0, pl.reciprocal(den, approx=True), 0.0)
        agg_ref[...] = (acc_sc[...] * inv).astype(agg_ref.dtype)


# ---------------------------------------------------------------------------
# Kernel 2: cell phase — face gather, 2-layer MLP, node scatter_mean.
# node_out is a VMEM-resident accumulator across cell tiles; lane `fout_dim`
# (set to 1.0 via b2 padding) carries the scatter_mean counts.
# ---------------------------------------------------------------------------
def _cell_kernel(face_ref, cell_ref, agg_ref, w1a_ref, w1b_ref, b1_ref, w2_ref, b2_ref,
                 cell_out_ref, node_out_ref, *, n_pad, fout_dim):
    i = pl.program_id(0)
    tc = face_ref.shape[0]

    @pl.when(i == 0)
    def _init():
        node_out_ref[...] = jnp.zeros_like(node_out_ref)

    face = face_ref[...]                                     # [TC, 3] int32 (pad rows -> n_pad)
    lanes = lax.broadcasted_iota(jnp.int32, (tc, n_pad), 1)
    fm = ((face[:, 0:1] == lanes).astype(jnp.bfloat16)
          + (face[:, 1:2] == lanes).astype(jnp.bfloat16)
          + (face[:, 2:3] == lanes).astype(jnp.bfloat16))    # [TC, Np]

    # cell_agg = (node_agg[f0]+node_agg[f1]+node_agg[f2]) / 3   (node_agg is [Fp, Np])
    cell_agg = lax.dot_general(fm, agg_ref[...], (((1,), (1,)), ((), ())),
                               preferred_element_type=jnp.float32) * (1.0 / 3.0)   # [TC, Fp]

    # net(cat(cell_attr, cell_agg)) as a split matmul (avoids lane-axis concat)
    h = (jnp.dot(cell_ref[...], w1a_ref[...], preferred_element_type=jnp.float32)
         + jnp.dot(cell_agg.astype(jnp.bfloat16), w1b_ref[...],
                   preferred_element_type=jnp.float32)
         + b1_ref[...])
    h = jnp.maximum(h, 0.0)
    cell_new = (jnp.dot(h.astype(jnp.bfloat16), w2_ref[...],
                        preferred_element_type=jnp.float32) + b2_ref[...])   # [TC, Fout_p]
    cell_out_ref[...] = cell_new

    # scatter_mean numerator + count in one matmul (lane fout_dim of cell_new is 1.0)
    node_out_ref[...] += lax.dot_general(fm, cell_new.astype(jnp.bfloat16),
                                         (((0,), (0,)), ((), ())),
                                         preferred_element_type=jnp.float32)   # [Np, Fout_p]

    @pl.when(i == pl.num_programs(0) - 1)
    def _finalize():
        cnt = node_out_ref[:, fout_dim:fout_dim + 1]          # [Np, 1]
        inv = pl.reciprocal(jnp.maximum(cnt, 1.0), approx=True)
        node_out_ref[...] = node_out_ref[...] * inv


def cell_block_forward(edge_attr, node_emb, receivers, senders, face, cell_attr,
                       w1, b1, w2, b2, *, scale, tile_e=256, tile_c=128,
                       vmem_limit_bytes=64 * 1024 * 1024):
    """CellBlock forward (attention=True). Returns (cell_attr_new, node_attr)."""
    f32, bf16 = jnp.float32, jnp.bfloat16

    E, F = edge_attr.shape
    N = node_emb.shape[0]
    C, Fc = cell_attr.shape
    H = w1.shape[1]
    Fout = w2.shape[1]
    assert w1.shape[0] == Fc + F

    te = _round_up(max(tile_e, 8), 8)
    tc = _round_up(max(tile_c, 8), 8)

    n_pad = _round_up(max(N, 1), 128)        # node axis (lanes of one-hots)
    f_pad = _round_up(F + 1, 128)            # edge/emb features + reserved denom lane (index F)
    fc_pad = _round_up(max(Fc, 1), 128)
    h_pad = _round_up(max(H, 1), 128)
    fout_pad = _round_up(Fout + 1, 128)      # MLP output + reserved count lane (index Fout)

    e2 = 2 * E
    e2_pad = _round_up(max(e2, te), te)
    c_pad = _round_up(max(C, tc), tc)

    # ---- padded / stacked operands (r/s halves fused in the wrapper) -----------
    edge2 = jnp.zeros((e2_pad, f_pad), bf16)
    edge2 = edge2.at[:E, :F].set(edge_attr.astype(bf16))
    edge2 = edge2.at[E:e2, :F].set(edge_attr.astype(bf16))
    edge2 = edge2.at[:e2, F].set(1.0)                         # ones lane -> softmax denominator
    idx2 = jnp.full((e2_pad, 1), n_pad, jnp.int32)            # pad index -> all-zero one-hot row
    idx2 = idx2.at[:E, 0].set(receivers.astype(jnp.int32))
    idx2 = idx2.at[E:e2, 0].set(senders.astype(jnp.int32))

    emb_p = jnp.zeros((n_pad, f_pad), bf16).at[:N, :F].set(node_emb.astype(bf16))
    cell_p = jnp.zeros((c_pad, fc_pad), bf16).at[:C, :Fc].set(cell_attr.astype(bf16))
    face_p = jnp.full((c_pad, 3), n_pad, jnp.int32).at[:C, :].set(face.astype(jnp.int32))

    w1a = jnp.zeros((fc_pad, h_pad), bf16).at[:Fc, :H].set(w1[:Fc].astype(bf16))
    w1b = jnp.zeros((f_pad, h_pad), bf16).at[:F, :H].set(w1[Fc:Fc + F].astype(bf16))
    b1p = jnp.zeros((1, h_pad), f32).at[0, :H].set(b1.reshape(-1).astype(f32))
    w2p = jnp.zeros((h_pad, fout_pad), bf16).at[:H, :Fout].set(w2.astype(bf16))
    b2p = jnp.zeros((1, fout_pad), f32).at[0, :Fout].set(b2.reshape(-1).astype(f32))
    b2p = b2p.at[0, Fout].set(1.0)                            # count lane -> scatter_mean counts

    # ---- phase 1: edge -> node aggregation (online scatter-softmax) -------------
    n_e_tiles = e2_pad // te
    edge_kernel = functools.partial(_edge_kernel, n_pad=n_pad, f_dim=F,
                                    inv_scale=1.0 / float(scale))
    node_agg_t = pl.pallas_call(
        edge_kernel,
        out_shape=jax.ShapeDtypeStruct((f_pad, n_pad), bf16),
        grid_spec=pltpu.PrefetchScalarGridSpec(
            num_scalar_prefetch=0,
            grid=(n_e_tiles,),
            in_specs=[
                pl.BlockSpec((te, f_pad), lambda i: (i, 0)),       # stacked two-way edges
                pl.BlockSpec((te, 1), lambda i: (i, 0)),           # outdegree index
                pl.BlockSpec((n_pad, f_pad), lambda i: (0, 0)),    # node embedding (resident)
            ],
            out_specs=pl.BlockSpec((f_pad, n_pad), lambda i: (0, 0)),
            scratch_shapes=[pltpu.VMEM((1, n_pad), f32),           # running segment max
                            pltpu.VMEM((f_pad, n_pad), f32)],      # f32 accumulator
        ),
        compiler_params=pltpu.CompilerParams(
            dimension_semantics=("arbitrary",),                    # online softmax => reduction
            vmem_limit_bytes=vmem_limit_bytes),
    )(edge2, idx2, emb_p)

    # ---- phase 2: cell MLP + node scatter_mean ----------------------------------
    n_c_tiles = c_pad // tc
    cell_kernel = functools.partial(_cell_kernel, n_pad=n_pad, fout_dim=Fout)
    cell_out, node_out = pl.pallas_call(
        cell_kernel,
        out_shape=(jax.ShapeDtypeStruct((c_pad, fout_pad), f32),
                   jax.ShapeDtypeStruct((n_pad, fout_pad), f32)),
        grid_spec=pltpu.PrefetchScalarGridSpec(
            num_scalar_prefetch=0,
            grid=(n_c_tiles,),
            in_specs=[
                pl.BlockSpec((tc, 3), lambda i: (i, 0)),            # face indices
                pl.BlockSpec((tc, fc_pad), lambda i: (i, 0)),       # cell_attr
                pl.BlockSpec((f_pad, n_pad), lambda i: (0, 0)),     # node_agg (resident, bf16)
                pl.BlockSpec((fc_pad, h_pad), lambda i: (0, 0)),    # w1a
                pl.BlockSpec((f_pad, h_pad), lambda i: (0, 0)),     # w1b
                pl.BlockSpec((1, h_pad), lambda i: (0, 0)),         # b1
                pl.BlockSpec((h_pad, fout_pad), lambda i: (0, 0)),  # w2
                pl.BlockSpec((1, fout_pad), lambda i: (0, 0)),      # b2 (+count lane)
            ],
            out_specs=(pl.BlockSpec((tc, fout_pad), lambda i: (i, 0)),
                       pl.BlockSpec((n_pad, fout_pad), lambda i: (0, 0))),
        ),
        compiler_params=pltpu.CompilerParams(
            dimension_semantics=("arbitrary",),                     # node_out is an accumulator
            vmem_limit_bytes=vmem_limit_bytes),
    )(face_p, cell_p, node_agg_t, w1a, w1b, b1p, w2p, b2p)

    return cell_out[:C, :Fout], node_out[:N, :Fout]


def _reference(edge_attr, node_emb, receivers, senders, face, cell_attr,
               w1, b1, w2, b2, scale):
    """Pure-JAX f32 reference with the exact PyTorch concat/scatter semantics."""
    N = node_emb.shape[0]
    two_idx = jnp.concatenate([receivers, senders], axis=0)            # outdegree
    two_edge = jnp.concatenate([edge_attr, edge_attr], axis=0)
    src = jnp.sum(two_edge * node_emb[two_idx], axis=1) / scale
    seg_max = jax.ops.segment_max(src, two_idx, num_segments=N)
    ex = jnp.exp(src - seg_max[two_idx])
    den = jax.ops.segment_sum(ex, two_idx, num_segments=N)
    att = (ex / den[two_idx])[:, None]
    node_agg = jax.ops.segment_sum(two_edge * att, two_idx, num_segments=N)
    cell_agg = (node_agg[face[:, 0]] + node_agg[face[:, 1]] + node_agg[face[:, 2]]) / 3.0
    h = jnp.maximum(jnp.concatenate([cell_attr, cell_agg], axis=1) @ w1 + b1, 0.0)
    cell_new = h @ w2 + b2
    idx3 = jnp.concatenate([face[:, 0], face[:, 1], face[:, 2]], axis=0)
    ssum = jax.ops.segment_sum(jnp.concatenate([cell_new] * 3, axis=0), idx3, num_segments=N)
    cnt = jax.ops.segment_sum(jnp.ones(idx3.shape[0], jnp.float32), idx3, num_segments=N)
    node_attr = ssum / jnp.maximum(cnt, 1.0)[:, None]
    return cell_new, node_attr


if __name__ == "__main__":
    # Small shapes consistent with the module's forward.
    N_nodes = 16      # graph_node.num_nodes
    C_cells = 12      # number of cells
    E_edges = 24      # number of node-graph edges
    F = 8             # input_size (edge_attr / node_embedding / cell_attr feature dim)
    H = 16            # attention_size (hidden width of custom_func MLP)
    Fout = 8          # custom_func output dim
    scale = float(np.sqrt(F))   # self.scale = sqrt(input_size)

    key = jax.random.PRNGKey(0)
    ks = jax.random.split(key, 10)
    edge_attr = jax.random.normal(ks[0], (E_edges, F), jnp.float32)
    node_emb = jax.random.normal(ks[1], (N_nodes, F), jnp.float32)
    cell_attr = jax.random.normal(ks[2], (C_cells, F), jnp.float32)
    senders = jax.random.randint(ks[3], (E_edges,), 0, N_nodes, jnp.int32)
    receivers = jax.random.randint(ks[4], (E_edges,), 0, N_nodes, jnp.int32)
    face = jax.random.randint(ks[5], (C_cells, 3), 0, N_nodes, jnp.int32)   # graph_node.face.T

    # Deterministic params for custom_func: Linear(2F,H)-ReLU-Linear(H,Fout)
    w1 = 0.1 * jax.random.normal(ks[6], (2 * F, H), jnp.float32)
    b1 = 0.01 * jax.random.normal(ks[7], (1, H), jnp.float32)
    w2 = 0.1 * jax.random.normal(ks[8], (H, Fout), jnp.float32)
    b2 = 0.01 * jax.random.normal(ks[9], (1, Fout), jnp.float32)

    # Small tiles so the demo exercises multiple grid steps of both accumulating kernels
    # (2E=48 -> 3 edge tiles, C=12 -> 2 cell tiles). Defaults are 256 / 128 for real sizes.
    cell_new, node_attr = cell_block_forward(
        edge_attr, node_emb, receivers, senders, face, cell_attr,
        w1, b1, w2, b2, scale=scale, tile_e=16, tile_c=8)
    jax.block_until_ready((cell_new, node_attr))

    # edge_attr / edge_index in the returned Data(...) are pure pass-throughs; only the
    # computed tensors are checked. Tolerance is looser than f32 because the MXU inputs
    # (one-hots + features + MLP weights) are bf16 per the perf guidance; softmax math
    # and all accumulations stay f32.
    ref_cell, ref_node = _reference(edge_attr, node_emb, receivers, senders, face,
                                    cell_attr, w1, b1, w2, b2, scale)
    np.testing.assert_allclose(np.asarray(cell_new), np.asarray(ref_cell), rtol=3e-2, atol=3e-2)
    np.testing.assert_allclose(np.asarray(node_attr), np.asarray(ref_node), rtol=3e-2, atol=3e-2)

    print("KERNEL_OK")
</pallas_src>

<mosaic_0001>
module attributes {stable_mosaic.version = 11 : i64} {
  func.func @_edge_kernel(%arg0: i32, %arg1: memref<16x128xbf16, #tpu.memory_space<vmem>>, %arg2: memref<16x1xi32, #tpu.memory_space<vmem>>, %arg3: memref<128x128xbf16, #tpu.memory_space<vmem>>, %arg4: memref<128x128xbf16, #tpu.memory_space<vmem>>, %arg5: memref<1x128xf32, #tpu.memory_space<vmem>>, %arg6: memref<128x128xf32, #tpu.memory_space<vmem>>) attributes {dimension_semantics = [#tpu.dimension_semantics<arbitrary>], iteration_bounds = array<i64: 3>, scalar_prefetch = 0 : i64, scratch_operands = 2 : i64, tpu.core_type = #tpu.core_type<tc>, window_params = [{transform_indices = @transform_0, window_bounds = array<i64: 16, 128>}, {transform_indices = @transform_1, window_bounds = array<i64: 16, 1>}, {pipeline_mode = #tpu.pipeline_mode<synchronous>, transform_indices = @transform_2, window_bounds = array<i64: 128, 128>}, {pipeline_mode = #tpu.pipeline_mode<synchronous>, transform_indices = @transform_3, window_bounds = array<i64: 128, 128>}]} {
    %c0_i32 = arith.constant 0 : i32
    %0 = arith.cmpi eq, %arg0, %c0_i32 : i32
    %1 = arith.extui %0 : i1 to i32
    %c0_i32_0 = arith.constant 0 : i32
    %2 = arith.cmpi ne, %1, %c0_i32_0 : i32
    scf.if %2 {
      %cst_24 = arith.constant -1.000000e+30 : f32
      %54 = vector.broadcast %cst_24 : f32 to vector<1x128xf32>
      %c0_25 = arith.constant 0 : index
      %c0_26 = arith.constant 0 : index
      %55 = vector.load %arg5[%c0_25, %c0_26] : memref<1x128xf32, #tpu.memory_space<vmem>>, vector<1x128xf32>
      tpu.vector_store %arg5[%c0_25, %c0_26], %54 {strides = array<i32>} : memref<1x128xf32, #tpu.memory_space<vmem>>, vector<1x128xf32>,
      %cst_27 = arith.constant 0.000000e+00 : f32
      %56 = vector.broadcast %cst_27 : f32 to vector<128x128xf32>
      %c0_28 = arith.constant 0 : index
      %c0_29 = arith.constant 0 : index
      %57 = vector.load %arg6[%c0_28, %c0_29] : memref<128x128xf32, #tpu.memory_space<vmem>>, vector<128x128xf32>
      tpu.vector_store %arg6[%c0_28, %c0_29], %56 {strides = array<i32>} : memref<128x128xf32, #tpu.memory_space<vmem>>, vector<128x128xf32>,
    } else {
    }
    %c0 = arith.constant 0 : index
    %c0_1 = arith.constant 0 : index
    %3 = vector.load %arg1[%c0, %c0_1] : memref<16x128xbf16, #tpu.memory_space<vmem>>, vector<16x128xbf16>
    %c0_2 = arith.constant 0 : index
    %c0_3 = arith.constant 0 : index
    %4 = vector.load %arg2[%c0_2, %c0_3] : memref<16x1xi32, #tpu.memory_space<vmem>>, vector<16x1xi32>
    %5 = tpu.iota {dimensions = array<i32: 1>} : vector<16x128xi32>
    %6 = vector.broadcast %4 : vector<16x1xi32> to vector<16x128xi32>
    %7 = arith.cmpi eq, %6, %5 : vector<16x128xi32>
    %8 = arith.extui %7 : vector<16x128xi1> to vector<16x128xi32>
    %9 = arith.sitofp %8 : vector<16x128xi32> to vector<16x128xf32>
    %10 = arith.truncf %9 : vector<16x128xf32> to vector<16x128xbf16>
    %c0_4 = arith.constant 0 : index
    %c0_5 = arith.constant 0 : index
    %11 = vector.load %arg3[%c0_4, %c0_5] : memref<128x128xbf16, #tpu.memory_space<vmem>>, vector<128x128xbf16>
    %cst = arith.constant dense<0.000000e+00> : vector<16x128xf32>
    %12 = tpu.matmul %10, %11, %cst {dimension_numbers = #tpu.dot_dimension_numbers<[1], [0], [0], [1], [0, 0, 1, 1], [], []>} : vector<16x128xbf16>, vector<128x128xbf16>, vector<16x128xf32> -> vector<16x128xf32>
    %13 = arith.extf %3 : vector<16x128xbf16> to vector<16x128xf32>
    %14 = arith.mulf %13, %12 : vector<16x128xf32>
    %cst_6 = arith.constant dense<0.000000e+00> : vector<16xf32>
    %15 = vector.multi_reduction <add>, %14, %cst_6 [1] : vector<16x128xf32> to vector<16xf32>
    %16 = vector.shape_cast %15 : vector<16xf32> to vector<16x1xf32>
    %cst_7 = arith.constant 0.353553385 : f32
    %17 = vector.broadcast %cst_7 : f32 to vector<16x1xf32>
    %18 = arith.mulf %16, %17 : vector<16x1xf32>
    %cst_8 = arith.constant -1.000000e+30 : f32
    %19 = vector.shape_cast %18 : vector<16x1xf32> to vector<16x1xf32>
    %20 = vector.broadcast %19 : vector<16x1xf32> to vector<16x128xf32>
    %21 = vector.broadcast %cst_8 : f32 to vector<16x128xf32>
    %22 = arith.select %7, %20, %21 : vector<16x128xi1>, vector<16x128xf32>
    %c0_9 = arith.constant 0 : index
    %c0_10 = arith.constant 0 : index
    %23 = vector.load %arg5[%c0_9, %c0_10] : memref<1x128xf32, #tpu.memory_space<vmem>>, vector<1x128xf32>
    %cst_11 = arith.constant dense<0xFF800000> : vector<128xf32>
    %24 = vector.multi_reduction <maximumf>, %22, %cst_11 [0] : vector<16x128xf32> to vector<128xf32>
    %25 = vector.shape_cast %24 : vector<128xf32> to vector<1x128xf32>
    %26 = arith.maximumf %23, %25 : vector<1x128xf32>
    %27 = arith.subf %23, %26 : vector<1x128xf32>
    %28 = math.exp %27 : vector<1x128xf32>
    %c0_12 = arith.constant 0 : index
    %c0_13 = arith.constant 0 : index
    %29 = vector.load %arg5[%c0_12, %c0_13] : memref<1x128xf32, #tpu.memory_space<vmem>>, vector<1x128xf32>
    tpu.vector_store %arg5[%c0_12, %c0_13], %26 {strides = array<i32>} : memref<1x128xf32, #tpu.memory_space<vmem>>, vector<1x128xf32>,
    %cst_14 = arith.constant -1.000000e+29 : f32
    %30 = vector.broadcast %cst_14 : f32 to vector<1x128xf32>
    %31 = arith.cmpf ogt, %26, %30 : vector<1x128xf32>
    %cst_15 = arith.constant 0.000000e+00 : f32
    %32 = vector.broadcast %cst_15 : f32 to vector<1x128xf32>
    %33 = arith.select %31, %26, %32 : vector<1x128xi1>, vector<1x128xf32>
    %34 = vector.broadcast %33 : vector<1x128xf32> to vector<16x128xf32>
    %35 = arith.subf %22, %34 : vector<16x128xf32>
    %cst_16 = arith.constant dense<0xFF800000> : vector<16xf32>
    %36 = vector.multi_reduction <maximumf>, %35, %cst_16 [1] : vector<16x128xf32> to vector<16xf32>
    %37 = vector.shape_cast %36 : vector<16xf32> to vector<16x1xf32>
    %cst_17 = arith.constant 0.000000e+00 : f32
    %38 = vector.broadcast %cst_17 : f32 to vector<16x1xf32>
    %39 = arith.minimumf %37, %38 : vector<16x1xf32>
    %40 = math.exp %39 : vector<16x1xf32>
    %41 = arith.extf %3 : vector<16x128xbf16> to vector<16x128xf32>
    %42 = vector.broadcast %40 : vector<16x1xf32> to vector<16x128xf32>
    %43 = arith.mulf %41, %42 : vector<16x128xf32>
    %44 = arith.truncf %43 : vector<16x128xf32> to vector<16x128xbf16>
    %cst_18 = arith.constant dense<0.000000e+00> : vector<128x128xf32>
    %45 = tpu.matmul %44, %10, %cst_18 {dimension_numbers = #tpu.dot_dimension_numbers<[0], [0], [1], [1], [0, 1, 1, 1], [], []>} : vector<16x128xbf16>, vector<16x128xbf16>, vector<128x128xf32> -> vector<128x128xf32>
    %c0_19 = arith.constant 0 : index
    %c0_20 = arith.constant 0 : index
    %46 = vector.load %arg6[%c0_19, %c0_20] : memref<128x128xf32, #tpu.memory_space<vmem>>, vector<128x128xf32>
    %47 = vector.broadcast %28 : vector<1x128xf32> to vector<128x128xf32>
    %48 = arith.mulf %46, %47 : vector<128x128xf32>
    %49 = arith.addf %48, %45 : vector<128x128xf32>
    %c0_21 = arith.constant 0 : index
    %c0_22 = arith.constant 0 : index
    %50 = vector.load %arg6[%c0_21, %c0_22] : memref<128x128xf32, #tpu.memory_space<vmem>>, vector<128x128xf32>
    tpu.vector_store %arg6[%c0_21, %c0_22], %49 {strides = array<i32>} : memref<128x128xf32, #tpu.memory_space<vmem>>, vector<128x128xf32>,
    %c2_i32 = arith.constant 2 : i32
    %51 = arith.cmpi eq, %arg0, %c2_i32 : i32
    %52 = arith.extui %51 : i1 to i32
    %c0_i32_23 = arith.constant 0 : i32
    %53 = arith.cmpi ne, %52, %c0_i32_23 : i32
    scf.if %53 {
      %c8 = arith.constant 8 : index
      %c0_24 = arith.constant 0 : index
      %54 = vector.load %arg6[%c8, %c0_24] : memref<128x128xf32, #tpu.memory_space<vmem>>, vector<1x128xf32>
      %cst_25 = arith.constant 0.000000e+00 : f32
      %55 = vector.broadcast %cst_25 : f32 to vector<1x128xf32>
      %56 = arith.cmpf ogt, %54, %55 : vector<1x128xf32>
      %57 = tpu.reciprocal %54 {approx = true} : vector<1x128xf32> -> vector<1x128xf32>
      %cst_26 = arith.constant 0.000000e+00 : f32
      %58 = vector.broadcast %cst_26 : f32 to vector<1x128xf32>
      %59 = arith.select %56, %57, %58 : vector<1x128xi1>, vector<1x128xf32>
      %c0_27 = arith.constant 0 : index
      %c0_28 = arith.constant 0 : index
      %60 = vector.load %arg6[%c0_27, %c0_28] : memref<128x128xf32, #tpu.memory_space<vmem>>, vector<128x128xf32>
      %61 = vector.broadcast %59 : vector<1x128xf32> to vector<128x128xf32>
      %62 = arith.mulf %60, %61 : vector<128x128xf32>
      %63 = arith.truncf %62 : vector<128x128xf32> to vector<128x128xbf16>
      %c0_29 = arith.constant 0 : index
      %c0_30 = arith.constant 0 : index
      %64 = vector.load %arg4[%c0_29, %c0_30] : memref<128x128xbf16, #tpu.memory_space<vmem>>, vector<128x128xbf16>
      tpu.vector_store %arg4[%c0_29, %c0_30], %63 {strides = array<i32>} : memref<128x128xbf16, #tpu.memory_space<vmem>>, vector<128x128xbf16>,
    } else {
    }
    return
  }
  func.func @transform_0(%arg0: i32) -> (i32, i32) {
    %c0_i32 = arith.constant 0 : i32
    %c0_i32_0 = arith.constant 0 : i32
    return %arg0, %c0_i32 : i32, i32
  }
  func.func @transform_1(%arg0: i32) -> (i32, i32) {
    %c0_i32 = arith.constant 0 : i32
    %c0_i32_0 = arith.constant 0 : i32
    return %arg0, %c0_i32 : i32, i32
  }
  func.func @transform_2(%arg0: i32) -> (i32, i32) {
    %c0_i32 = arith.constant 0 : i32
    %c0_i32_0 = arith.constant 0 : i32
    %c0_i32_1 = arith.constant 0 : i32
    return %c0_i32, %c0_i32_0 : i32, i32
  }
  func.func @transform_3(%arg0: i32) -> (i32, i32) {
    %c0_i32 = arith.constant 0 : i32
    %c0_i32_0 = arith.constant 0 : i32
    %c0_i32_1 = arith.constant 0 : i32
    return %c0_i32, %c0_i32_0 : i32, i32
  }
}

</mosaic_0001>

<bundles_post_ra>
// kernel: tpu_custom_call.1
= control target key start
LH: loop header
LB: loop body
LE: loop exit
PB: predicated region body
PF: predicated region fallthrough
CT: control target
= control target key end

     0   :  { %8 = vsyncpa [#allocation5], 0  ;;  %s1582_s0 = inlined_call_operand.hbm [shape: bf16[48,128], index: 0, kind: input, shape index: {}]   ;;  %s1583_s1 = inlined_call_operand.hbm [shape: s32[48,1], index: 1, kind: input, shape index: {}]   ;;  %s1584_s2 = inlined_call_operand.hbm [shape: bf16[128,128], index: 2, kind: input, shape index: {}]   ;;  %s1585_s3 = inlined_call_operand.hbm [shape: bf16[128,128], index: 3, kind: output, shape index: {}]  }
   0x1   :  { %10 = vsyncpa [#allocation5 + $0x1], 0 }
   0x2   :  { %11 = vsyncpa [#allocation8], 0 }
   0x3   :  { %13 = vsyncpa [#allocation8 + $0x1], 0 }
   0x4   :  { %14 = vsyncpa [#allocation6], 0  ;;  %s1322_s12 = smov 0   ;;  %s1324_s13 = smov 0  }
   0x5   :  { %s1326_s14 = smov 0   ;;  %s1328_s15 = smov 0  }
   0x6 LB: > { %s1341_s16 = sadd.s32 4294967295, %s1284_s15   ;;  %p40_p0 = scmp.ne.s32.totalorder %s1276_s13, %s1272_s12  ;;  %s1284_s15 = sphi %s1328_s15, %s1601_s15   ;;  %s1280_s14 = sphi %s1326_s14, %s1600_s14   ;;  %s1276_s13 = sphi %s1324_s13, %s1599_s13   ;;  %s1272_s12 = sphi %s1322_s12, %s1598_s12  }
   0x7   : > { %p1586_p1 = scmp.eq.s32.totalorder %s1341_s16, 0  ;;  %p851_p2 = scmp.ge.s32.totalorder %s1284_s15, 1 }
   0x8   : > { %p119_p3 = scmp.lt.s32.totalorder %s1284_s15, 4  ;;  %s1286_s19 = smov [#allocation9]  }
   0x9   : > { %p1350_p5 = por %p1586_p1, %p40_p0  ;;  %s131_s20 = sshll.u32 %s1286_s19, 4  ;;  %s132_s20 = int_to_ptr.vmem [resolvable:$true] %s131_s20 }
   0xa   : > { %p1354_p6 = pnand %p851_p2, %p119_p3  ;;  %s1367_s22 = sadd.s32 1, %s1284_s15  }
   0xb   : > { %s1589_s17 = scalar_select %p1350_p5, 1, 0 }
   0xc   : > { %s1590_s18 = scalar_select %p1354_p6, 1, 0 }
   0xd   : > { %p1045_p7 = pneg %p1354_p6  ;;  %s27_s23 = sadd.s32 1, %s1280_s14 }
   0xe   : > { %s24_s24 = ssub.s32 %s1284_s15, %s1367_s22  ;;  %s1124_s27 = scalar_lea.hbm %s1584_s2, 1024 }
   0xf   : > { %p1362_p8 = pnand %p1045_p7, %p1586_p1  ;;  %p1125_p9 = scmp.ne.s32.totalorder %s1584_s2, %s1124_s27 }
  0x10   : > { %p1131_p13 = scmp.lt.u32.totalorder %s1124_s27, %s1584_s2 }
  0x11   : > { %p1126_p10 = pneg %p1362_p8 }
  0x13   : > { %p1127_p11 = pnand %p1126_p10, %p1125_p9 }
  0x15   : > { %p1128_p12 = pneg %p1127_p11 }
  0x17   : > { %p1133_p0 = pnand %p1131_p13, %p1128_p12 }
  0x19   : > { %1136 = shalt.err (!%p1133_p0)
}
  0x1a   : > { %s1137_s5 = scalar_lea.vmem %s132_s20, 1024  ;;  %p1145_p4 = scmp.lt.s32.totalorder %s132_s20, %s132_s20 }
  0x1b   : > { %p1138_p2 = scmp.ne.s32.totalorder %s132_s20, %s1137_s5  ;;  %p1146_p1 = scmp.lt.s32.totalorder %s1137_s5, %s1137_s5 }
  0x1d   : > { %p1140_p3 = pnand %p1138_p2, %p1126_p10  ;;  %p1147_p5 = por %p1146_p1, %p1145_p4 }
  0x1f   : > { %p1141_p7 = pneg %p1140_p3 }
  0x21   : > { %p1148_p6 = pnand %p1147_p5, %p1141_p7 }
  0x23   : > { %1151 = shalt.err (!%p1148_p6)
}
  0x24   : > { %s1287_s6 = smov 64   ;;  %s1288_s7 = smov 4  }
  0x25   : > { %1048 = dma.hbm_to_vmem [thread:$0]  (!%p1362_p8), %s1584_s2, 1024, %s132_s20, [#allocation8], %s1287_s6, %s1287_s6, %s1288_s7  }
  0x26   : > { %p25_p1 = scmp.eq.s32.totalorder %s24_s24, 0  ;;  %p34_p4 = scmp.ne.s32.totalorder %s1280_s14, %s1276_s13 }
  0x27   : > { %p35_p5 = scmp.eq.s32.totalorder %s1284_s15, 0  ;;  %p1057_p6 = scmp.lt.s32.totalorder %s1284_s15, 3 }
  0x28   : > { %s1396_s10 = scalar_select %p25_p1, %s1280_s14, %s27_s23  }
  0x29   : > { %p36_p9 = por %p35_p5, %p34_p4  ;;  %s1399_s11 = sand.u32 1, %s1280_s14  }
  0x2a   : > { %s854_s12 = sshll.u32 %s1399_s11, 3  ;;  %s908_s19 = sshll.u32 %s1284_s15, 7 }
  0x2b   : > { %s1406_s26 = scalar_lea.hbm %s1582_s0, %s908_s19  ;;  %s149_s20 = scalar_lea.vmem [#allocation4], %s854_s12 }
  0x2c   : > { %s156_s23 = sshll.u32 %s149_s20, 4  ;;  %p1410_p8 = pnand %p1057_p6, %p36_p9  ;;  %s1408_s23 = int_to_ptr.vmem [resolvable:$true] %s156_s23 }
  0x2d   : > { %s166_s27 = sand.u32 1, %s1284_s15   ;;  %s857_s28 = sshll.u32 %s1399_s11, 4 }
  0x2e   : > { %s146_s29 = scalar_lea.sflag [#allocation5], %s1399_s11  ;;  %s1152_s30 = scalar_lea.hbm %s1406_s26, 128 }
  0x2f   : > { %p1153_p10 = scmp.ne.s32.totalorder %s1406_s26, %s1152_s30  ;;  %p1154_p11 = pneg %p1410_p8 }
  0x30   : > { %s1157_s8 = scalar_lea.hbm %s1582_s0, 384  ;;  %p1158_p0 = scmp.lt.u32.totalorder %s1406_s26, %s1582_s0 }
  0x31   : > { %p1155_p12 = pnand %p1154_p11, %p1153_p10  ;;  %p1159_p2 = scmp.lt.u32.totalorder %s1157_s8, %s1152_s30 }
  0x32   : > { %p1161_p7 = scmp.lt.u32.totalorder %s1152_s30, %s1406_s26 }
  0x33   : > { %p1156_p13 = pneg %p1155_p12  ;;  %p1160_p3 = por %p1159_p2, %p1158_p0 }
  0x35   : > { %p1162_p1 = por %p1161_p7, %p1160_p3 }
  0x37   : > { %p1163_p4 = pnand %p1162_p1, %p1156_p13 }
  0x39   : > { %1166 = shalt.err (!%p1163_p4)
}
  0x3a   : > { %s1167_s19 = scalar_lea.vmem %s1408_s23, 128  ;;  %s1289_s21 = smov [#allocation4]  }
  0x3b   : > { %p1168_p5 = scmp.ne.s32.totalorder %s1408_s23, %s1167_s19  ;;  %s1172_s25 = sshll.u32 %s1289_s21, 4  ;;  %s1173_s25 = int_to_ptr.vmem [resolvable:$false] %s1172_s25 }
  0x3c   : > { %s1174_s20 = scalar_lea.vmem %s1173_s25, 256  ;;  %p1175_p10 = scmp.lt.s32.totalorder %s1408_s23, %s1173_s25 }
  0x3d   : > { %p1170_p6 = pnand %p1168_p5, %p1154_p11  ;;  %p1176_p12 = scmp.lt.s32.totalorder %s1174_s20, %s1167_s19 }
  0x3f   : > { %p1171_p9 = pneg %p1170_p6  ;;  %p1177_p0 = por %p1176_p12, %p1175_p10 }
  0x41   : > { %p1178_p2 = pnand %p1177_p0, %p1171_p9 }
  0x43   : > { %1181 = shalt.err (!%p1178_p2)
}
  0x44   : > { %1052 = dma.hbm_to_vmem [thread:$0]  (!%p1410_p8), %s1406_s26, 128, %s1408_s23, %s146_s29, %s1287_s6, %s1287_s6, %s1288_s7  }
  0x45   : > { %s909_s30 = sshll.u32 %s1284_s15, 8  ;;  %s170_s9 = scalar_lea.vmem [#allocation7], %s857_s28 }
  0x46   : > { %s1451_s8 = scalar_lea.hbm %s1583_s1, %s909_s30  ;;  %s177_s12 = sshll.u32 %s170_s9, 4  ;;  %s1455_s12 = int_to_ptr.vmem [resolvable:$true] %s177_s12 }
  0x47   : > { %s1459_s19 = scalar_lea.sflag [#allocation8], %s166_s27  ;;  %s1182_s21 = scalar_lea.hbm %s1451_s8, 256 }
  0x48   : > { %p1183_p13 = scmp.ne.s32.totalorder %s1451_s8, %s1182_s21  ;;  %s1187_s11 = scalar_lea.hbm %s1583_s1, 768 }
  0x49   : > { %p1188_p1 = scmp.lt.u32.totalorder %s1451_s8, %s1583_s1  ;;  %p1189_p4 = scmp.lt.u32.totalorder %s1187_s11, %s1182_s21 }
  0x4a   : > { %p1185_p3 = pnand %p1183_p13, %p1154_p11  ;;  %p1191_p6 = scmp.lt.u32.totalorder %s1182_s21, %s1451_s8 }
  0x4b   : > { %p1190_p5 = por %p1189_p4, %p1188_p1 }
  0x4c   : > { %p1186_p7 = pneg %p1185_p3 }
  0x4d   : > { %p1192_p9 = por %p1191_p6, %p1190_p5 }
  0x4f   : > { %p1193_p10 = pnand %p1192_p9, %p1186_p7 }
  0x51   : > { %1196 = shalt.err (!%p1193_p10)
}
  0x52   : > { %s1197_s15 = scalar_lea.vmem %s1455_s12, 256  ;;  %s1290_s27 = smov [#allocation7]  }
  0x53   : > { %p1198_p12 = scmp.ne.s32.totalorder %s1455_s12, %s1197_s15  ;;  %s1202_s28 = sshll.u32 %s1290_s27, 4  ;;  %s1203_s28 = int_to_ptr.vmem [resolvable:$false] %s1202_s28 }
  0x54   : > { %s1204_s29 = scalar_lea.vmem %s1203_s28, 512  ;;  %p1205_p13 = scmp.lt.s32.totalorder %s1455_s12, %s1203_s28 }
  0x55   : > { %p1200_p0 = pnand %p1198_p12, %p1154_p11  ;;  %p1206_p3 = scmp.lt.s32.totalorder %s1204_s29, %s1197_s15 }
  0x57   : > { %p1201_p2 = pneg %p1200_p0  ;;  %p1207_p1 = por %p1206_p3, %p1205_p13 }
  0x59   : > { %p1208_p4 = pnand %p1207_p1, %p1201_p2 }
  0x5b   : > { %1211 = shalt.err (!%p1208_p4)
}
  0x5c   : > { %s1291_s25 = smov 128   ;;  %s1292_s20 = smov 8  }
  0x5d   : > { %1055 = dma.hbm_to_vmem [thread:$0]  (!%p1410_p8), %s1451_s8, 256, %s1455_s12, %s1459_s19, %s1291_s25, %s1291_s25, %s1292_s20  }
  0x5e   : > { %p1593_p11 = scmp.ne.s32.totalorder %s1590_s18, 0 }
  0x5f   : > { %s191_s30 = sand.u32 (!%p1593_p11), 1, %s1276_s13   ;;  %p1594_p7 = scmp.ne.s32.totalorder (!%p1593_p11), %s1589_s17, 0 }
  0x60   : > { %189 = sbr.rel (%p1593_p11) target bundleno = 1191 (0x4a7), region = 32  ;;  %s861_s4 = sshll.u32 (!%p1593_p11), %s191_s30, 3 }
  0x61   : > { %s192_s5 = scalar_lea.sflag (!%p1593_p11), [#allocation5], %s191_s30  ;;  %s1488_s9 = scalar_lea.vmem (!%p1593_p11), [#allocation4], %s861_s4 }
  0x67   : > { %1255 = dma.done.wait (%p1594_p7), %s192_s5, 128  }
  0x68   : > { %1257 = vsyncadd (%p1594_p7), %s192_s5, 4294967168  ;;  %s200_s21 = sand.u32 1, %s1341_s16   ;;  %s862_s24 = sshll.u32 %s191_s30, 4 }
  0x69   : > { %s201_s8 = scalar_lea.sflag [#allocation8], %s200_s21  ;;  %s1495_s12 = scalar_lea.vmem [#allocation7], %s862_s24 }
  0x6a   : > { %1259 = dma.done.wait (%p1594_p7), %s201_s8, 256  }
  0x6b   : > { %1261 = vsyncadd (%p1594_p7), %s201_s8, 4294967040  ;;  %p1595_p8 = scmp.eq.s32.totalorder %s1341_s16, 0 }
  0x6d   : > { %1263 = dma.done.wait (%p1595_p8), [#allocation8], 1024   ;;  %p1596_p5 = pmov %p1595_p8 }
  0x6e   : > { %p1597_p6 = scmp.ne.s32.totalorder %s1341_s16, 0 }
  0x6f   : > { %1265 = vsyncadd (%p1596_p5), [#allocation8], 4294966272  ;;  %v1293_v0 = vmov (!%p1597_p6), -1e+30   ;;  %v1294_v1 = vmov (!%p1597_p6), 0.0  }
  0x70   : > { %237 = sbr.rel (%p1597_p6) target bundleno = 121 (0x79), region = 48  ;;  %238 = vst [vmem:[#allocation2] sm:$0x1] (!%p1597_p6), %v1293_v0  ;;  %239 = vst [vmem:[#allocation3] sm:$0xff] (!%p1597_p6), %v1294_v1 }
  0x71   : > { %240 = vst [vmem:[#allocation3 + $0x8] sm:$0xff] (!%p1597_p6), %v1294_v1  ;;  %241 = vst [vmem:[#allocation3 + $0x10] sm:$0xff] (!%p1597_p6), %v1294_v1 }
  0x72   : > { %242 = vst [vmem:[#allocation3 + $0x18] sm:$0xff] (!%p1597_p6), %v1294_v1  ;;  %243 = vst [vmem:[#allocation3 + $0x20] sm:$0xff] (!%p1597_p6), %v1294_v1 }
  0x73   : > { %244 = vst [vmem:[#allocation3 + $0x28] sm:$0xff] (!%p1597_p6), %v1294_v1  ;;  %245 = vst [vmem:[#allocation3 + $0x30] sm:$0xff] (!%p1597_p6), %v1294_v1 }
  0x74   : > { %246 = vst [vmem:[#allocation3 + $0x38] sm:$0xff] (!%p1597_p6), %v1294_v1  ;;  %247 = vst [vmem:[#allocation3 + $0x40] sm:$0xff] (!%p1597_p6), %v1294_v1 }
  0x75   : > { %248 = vst [vmem:[#allocation3 + $0x48] sm:$0xff] (!%p1597_p6), %v1294_v1  ;;  %249 = vst [vmem:[#allocation3 + $0x50] sm:$0xff] (!%p1597_p6), %v1294_v1 }
  0x76   : > { %250 = vst [vmem:[#allocation3 + $0x58] sm:$0xff] (!%p1597_p6), %v1294_v1  ;;  %251 = vst [vmem:[#allocation3 + $0x60] sm:$0xff] (!%p1597_p6), %v1294_v1 }
  0x77   : > { %252 = vst [vmem:[#allocation3 + $0x68] sm:$0xff] %v1294_v1  ;;  %253 = vst [vmem:[#allocation3 + $0x70] sm:$0xff] %v1294_v1 }
  0x78   : > { %254 = vst [vmem:[#allocation3 + $0x78] sm:$0xff] %v1294_v1 }
  0x79 PF: > { %v257_v2 = vld [vmem:[%s1495_s12] sm:$0xff]  ;;  %v1295_v3 = vmov 0   ;;  %v1296_v4 = vmov 0.0   ;;  %v258_v6 = vld [vmem:[%s1495_s12 + $0x8] sm:$0xff]  ;;  %vm1297_vm0 = vmmov 0   ;;  %v259_v14 = vlaneseq  ;;  %p887_p9 = scmp.ne.s32.totalorder %s1341_s16, 2 }
  0x7a   : > { %1107 = vset.pattern.permute.xlu0 %v1295_v3  ;;  %995 = vmatprep.subr.bf16.mxu0 %v1296_v4  ;;  %v1108_v5 = vld [vmem:[#allocation9] sm:$0xff]   ;;  %v1109_v7 = vld [vmem:[#allocation9 + $0x8] sm:$0xff]   ;;  %v1110_v8 = vld [vmem:[#allocation9 + $0x10] sm:$0xff]   ;;  %v1298_v18 = vmov 1.0|1.0   ;;  %vm443_vm5 = vcmask 130048  }
  0x7b   : > { %262 = vperm.xlu0 %1107, %v257_v2   ;;  %996 = vmatpush3.bf16.msra.mxu0 %v1108_v5  ;;  %v1111_v9 = vld [vmem:[#allocation9 + $0x18] sm:$0xff]   ;;  %v1112_v10 = vld [vmem:[#allocation9 + $0x20] sm:$0xff]   ;;  %v1113_v11 = vld [vmem:[#allocation9 + $0x28] sm:$0xff]   ;;  %v260_v16 = vand.u32 127, %v259_v14  ;;  %v408_v40 = vshrl.u32 %v259_v14, 7 }
  0x7c   : > { %997 = vmatprep.subr.bf16.mxu0 %v1296_v4  ;;  %1011 = vmatprep.mubr.msk.bf16.mxu0 %vm1297_vm0, %v1296_v4  ;;  %v1114_v12 = vld [vmem:[#allocation9 + $0x30] sm:$0xff]   ;;  %v1115_v13 = vld [vmem:[#allocation9 + $0x38] sm:$0xff]   ;;  %v391_v41 = vld [vmem:[#allocation2] sm:$0x1] }
  0x7d   : > { %v927_v19 = vld [vmem:[%s1488_s9] sm:$0xff]   ;;  %v1514_v44 = vsub.s32 0, %v408_v40 }
  0x7e   : > { %v928_v20 = vunpack.c.l.bf16 %v927_v19  ;;  %v929_v23 = vunpack.c.h.bf16 %v927_v19  ;;  %v575_v40 = vld [vmem:[#allocation3 + $0x50] sm:$0xff] }
  0x7f   : > { %265 = vperm.xlu0 %1107, %v258_v6   ;;  %998 = vmatpush3.bf16.msra.mxu0 %v1109_v7 }
  0x80   : > { %999 = vmatprep.subr.bf16.mxu0 %v1296_v4 }
  0x83   : > { %1000 = vmatpush3.bf16.msra.mxu0 %v1110_v8  ;;  %v567_v8 = vld [vmem:[#allocation3 + $0x10] sm:$0xff] }
  0x84   : > { %1001 = vmatprep.subr.bf16.mxu0 %v1296_v4 }
  0x87   : > { %1002 = vmatpush3.bf16.msra.mxu0 %v1111_v9  ;;  %v565_v9 = vld [vmem:[#allocation3] sm:$0xff] }
  0x88   : > { %1003 = vmatprep.subr.bf16.mxu0 %v1296_v4 }
  0x8b   : > { %1004 = vmatpush3.bf16.msra.mxu0 %v1112_v10  ;;  %v568_v10 = vld [vmem:[#allocation3 + $0x18] sm:$0xff] }
  0x8c   : > { %1005 = vmatprep.subr.bf16.mxu0 %v1296_v4 }
  0x8f   : > { %1006 = vmatpush3.bf16.msra.mxu0 %v1113_v11 }
  0x90   : > { %1007 = vmatprep.subr.bf16.mxu0 %v1296_v4 }
  0x93   : > { %1008 = vmatpush3.bf16.msra.mxu0 %v1114_v12  ;;  %v566_v12 = vld [vmem:[#allocation3 + $0x8] sm:$0xff] }
  0x94   : > { %1009 = vmatprep.subr.bf16.mxu0 %v1296_v4 }
  0x97   : > { %1010 = vmatpush3.bf16.msra.mxu0 %v1115_v13 }
  0xfa   : > { %v263_v15 = vpop.permute.xlu0 %262 }
  0xfb   : > { %vm267_vm1 = vcmp.eq.s32.totalorder %v263_v15, %v260_v16 }
  0xfe   : > { %v266_v17 = vpop.permute.xlu0 %265 }
  0xff   : > { %vm268_vm2 = vcmp.eq.s32.totalorder %v266_v17, %v260_v16 }
 0x100   : > { %vm875_vm3 = vmpackc.low %vm268_vm2, %vm267_vm1 }
 0x101   : > { %1012 = vmatmul.mubr.msk.bf16.vlgmr.msra.gmra.mrb[0].mxu0 %vm875_vm3, %v1298_v18  ;;  %1015 = vmatprep.subr.msk.bf16.mxu1 %vm875_vm3, %v1298_v18 }
 0x102   : > { %1016 = vmatpush3.bf16.msk.msra.mxu1 %vm875_vm3, %v1298_v18 }
 0x1d4   : > { %v372_v21 = vpop.f32.mrb[0].mxu0 }
 0x1d5   : > { %v1013_v22 = vpop.f32.mrb[1].mxu0  ;;  %v381_v24 = vmul.f32 %v928_v20, %v372_v21 }
 0x1d6   : > { %v375_v25 = vpop.f32.mrb[2].mxu0 }
 0x1d7   : > { %v1014_v26 = vpop.f32.mrb[3].mxu0  ;;  %383 = vadd.xlane.f32.xlu1 %v381_v24  ;;  %v382_v27 = vmul.f32 %v929_v23, %v375_v25  ;;  %v571_v24 = vld [vmem:[#allocation3 + $0x30] sm:$0xff]  ;;  %v569_v25 = vld [vmem:[#allocation3 + $0x20] sm:$0xff] }
 0x1d8   : > { %v572_v26 = vld [vmem:[#allocation3 + $0x38] sm:$0xff] }
 0x1db   : > { %385 = vadd.xlane.f32.xlu1 %v382_v27 }
 0x264   : > { %v384_v28 = vpop.xlane.xlu1 %383 }
 0x265   : > { %v387_v29 = vmul.f32 0.35355338, %v384_v28  ;;  %v570_v28 = vld [vmem:[#allocation3 + $0x28] sm:$0xff] }
 0x267   : > { %v389_v32 = vsel %vm267_vm1, %v387_v29, -1e+30 }
 0x268   : > { %v386_v30 = vpop.xlane.xlu1 %385 }
 0x269   : > { %v388_v31 = vmul.f32 0.35355338, %v386_v30 }
 0x26b   : > { %v390_v33 = vsel %vm268_vm2, %v388_v31, -1e+30 }
 0x26c   : > { %v392_v34 = vmax.f32 %v389_v32, %v390_v33 }
 0x26e   : > { %v393_v35 = vrot.slane %v392_v34, 4 }
 0x270   : > { %v394_v36 = vmax.f32 %v392_v34, %v393_v35 }
 0x272   : > { %v395_v37 = vrot.slane %v394_v36, 2 }
 0x274   : > { %v396_v38 = vmax.f32 %v394_v36, %v395_v37 }
 0x276   : > { %v397_v39 = vrot.slane %v396_v38, 1 }
 0x278   : > { %v398_v42 = vmax.f32 %v396_v38, %v397_v39 }
 0x27a   : > { %v399_v43 = vmax.f32 %v391_v41, %v398_v42  ;;  %v576_v42 = vld [vmem:[#allocation3 + $0x58] sm:$0xff] }
 0x27c   : > { %vm404_vm4 = vcmp.gt.f32.partialorder %v399_v43, -1e+29  ;;  %v400_v45 = vsub.f32 %v391_v41, %v399_v43  ;;  %403 = vst [vmem:[#allocation2] sm:$0x1] %v399_v43  ;;  %v573_v41 = vld [vmem:[#allocation3 + $0x40] sm:$0xff] }
 0x27d   : > { %v405_v46 = vsel %vm404_vm4, %v399_v43, 0.0 }
 0x27e   : > { %v410_v47 = vrot.slane %v405_v46, %v1514_v44  ;;  %v401_v48 = vmul.f32 1.442695, %v400_v45  ;;  %v574_v45 = vld [vmem:[#allocation3 + $0x48] sm:$0xff] }
 0x280   : > { %v413_v49 = vsub.f32 %v390_v33, %v410_v47  ;;  %1116 = vpow2.f32 %v401_v48  ;;  %v412_v50 = vsub.f32 %v389_v32, %v410_v47 }
 0x282   : > { %416 = vmax.xlane.f32.xlu1 %v413_v49  ;;  %414 = vmax.xlane.f32.xlu0 %v412_v50 }
 0x28a   : > { %v1117_v51 = vpop.eup %1116 }
 0x28b   : > { %v1518_v52 = vrot.slane %v1117_v51, %v1514_v44 }
 0x28d   : > { %v589_v11 = vmul.f32 %v1518_v52, %v567_v8  ;;  %v587_v14 = vmul.f32 %v1518_v52, %v565_v9  ;;  %v590_v17 = vmul.f32 %v1518_v52, %v568_v10  ;;  %v593_v27 = vmul.f32 %v1518_v52, %v571_v24 }
 0x28e   : > { %v591_v30 = vmul.f32 %v1518_v52, %v569_v25  ;;  %v594_v33 = vmul.f32 %v1518_v52, %v572_v26  ;;  %v592_v36 = vmul.f32 %v1518_v52, %v570_v28  ;;  %v597_v43 = vmul.f32 %v1518_v52, %v575_v40 }
 0x28f   : > { %v595_v47 = vmul.f32 %v1518_v52, %v573_v41  ;;  %v598_v50 = vmul.f32 %v1518_v52, %v576_v42 }
 0x30f   : > { %v417_v53 = vpop.xlane.xlu1 %416  ;;  %v415_v54 = vpop.xlane.xlu0 %414 }
 0x310   : > { %v419_v55 = vmin.f32 %v417_v53, 0.0  ;;  %v418_v56 = vmin.f32 %v415_v54, 0.0  ;;  %v596_v54 = vmul.f32 %v1518_v52, %v574_v45 }
 0x312   : > { %v422_v57 = vmul.f32 1.442695, %v419_v55  ;;  %v420_v58 = vmul.f32 1.442695, %v418_v56 }
 0x314   : > { %1118 = vpow2.f32 %v422_v57 }
 0x315   : > { %1120 = vpow2.f32 %v420_v58  ;;  %v579_v58 = vld [vmem:[#allocation3 + $0x70] sm:$0xff] }
 0x31e   : > { %v1119_v59 = vpop.eup %1118 }
 0x31f   : > { %v1121_v60 = vpop.eup %1120  ;;  %v425_v61 = vmul.f32 %v1119_v59, %v929_v23  ;;  %v577_v59 = vld [vmem:[#allocation3 + $0x60] sm:$0xff] }
 0x320   : > { %v424_v62 = vmul.f32 %v1121_v60, %v928_v20  ;;  %v588_v20 = vmul.f32 %v1518_v52, %v566_v12  ;;  %v580_v60 = vld [vmem:[#allocation3 + $0x78] sm:$0xff] }
 0x322   : > { %v426_v63 = vpack.c.bf16 %v425_v61, %v424_v62  ;;  %v601_v61 = vmul.f32 %v1518_v52, %v579_v58  ;;  %v578_v62 = vld [vmem:[#allocation3 + $0x68] sm:$0xff] }
 0x324   : > { %427 = vxpose.xlu1.c.b16.start.end [1/1] (short) %v426_v63, 128 }
 0x38a   : > { %v435_v0 = vpop.trf.xlu1 }
 0x38b   : > { %1017 = vmatprep.mubr.msk.bf16.mxu1 %vm443_vm5, %v435_v0  ;;  %v599_v0 = vmul.f32 %v1518_v52, %v577_v59 }
 0x38e   : > { %v436_v1 = vpop.trf.xlu1 }
 0x38f   : > { %1018 = vmatmul.mubr.msk.bf16.vlgmr.msra.gmra.mrb[0].mxu1 %vm443_vm5, %v436_v1 }
 0x392   : > { %v437_v2 = vpop.trf.xlu1 }
 0x393   : > { %1021 = vmatprep.mubr.msk.bf16.mxu1 %vm443_vm5, %v437_v2 }
 0x396   : > { %v438_v3 = vpop.trf.xlu1 }
 0x397   : > { %1022 = vmatmul.mubr.msk.bf16.gmra.mrb[4].mxu1 %vm443_vm5, %v438_v3  ;;  %v602_v3 = vmul.f32 %v1518_v52, %v580_v60 }
 0x39a   : > { %v439_v4 = vpop.trf.xlu1 }
 0x39b   : > { %1025 = vmatprep.mubr.msk.bf16.mxu1 %vm443_vm5, %v439_v4 }
 0x39e   : > { %v440_v5 = vpop.trf.xlu1 }
 0x39f   : > { %1026 = vmatmul.mubr.msk.bf16.gmra.mrb[8].mxu1 %vm443_vm5, %v440_v5 }
 0x3a2   : > { %v441_v6 = vpop.trf.xlu1 }
 0x3a3   : > { %1029 = vmatprep.mubr.msk.bf16.mxu1 %vm443_vm5, %v441_v6  ;;  %v600_v6 = vmul.f32 %v1518_v52, %v578_v62 }
 0x3a6   : > { %v442_v7 = vpop.trf.xlu1 }
 0x3a7   : > { %1030 = vmatmul.mubr.msk.bf16.gmra.mrb[12].mxu1 %vm443_vm5, %v442_v7 }
 0x462   : > { %v1019_v13 = vpop.f32.mrb[0].mxu1 }
 0x463   : > { %v605_v15 = vadd.f32 %v1019_v13, %v589_v11  ;;  %v502_v16 = vpop.f32.mrb[1].mxu1 }
 0x464   : > { %v603_v18 = vadd.f32 %v587_v14, %v502_v16  ;;  %v1020_v19 = vpop.f32.mrb[2].mxu1 }
 0x465   : > { %621 = vst [vmem:[#allocation3 + $0x10] sm:$0xff] %v605_v15  ;;  %v606_v21 = vadd.f32 %v1020_v19, %v590_v17  ;;  %v505_v22 = vpop.f32.mrb[3].mxu1 }
 0x466   : > { %619 = vst [vmem:[#allocation3] sm:$0xff] %v603_v18  ;;  %v604_v23 = vadd.f32 %v588_v20, %v505_v22 }
 0x467   : > { %622 = vst [vmem:[#allocation3 + $0x18] sm:$0xff] %v606_v21 }
 0x468   : > { %620 = vst [vmem:[#allocation3 + $0x8] sm:$0xff] %v604_v23 }
 0x46a   : > { %v1023_v29 = vpop.f32.mrb[4].mxu1 }
 0x46b   : > { %v609_v31 = vadd.f32 %v1023_v29, %v593_v27  ;;  %v518_v32 = vpop.f32.mrb[5].mxu1 }
 0x46c   : > { %v607_v34 = vadd.f32 %v591_v30, %v518_v32  ;;  %v1024_v35 = vpop.f32.mrb[6].mxu1  ;;  %v645_v15 = vld [vmem:[#allocation3 + $0x10] sm:$0xff] (!%p887_p9) }
 0x46d   : > { %625 = vst [vmem:[#allocation3 + $0x30] sm:$0xff] %v609_v31  ;;  %v610_v37 = vadd.f32 %v1024_v35, %v594_v33  ;;  %v521_v38 = vpop.f32.mrb[7].mxu1  ;;  %v643_v12 = vld [vmem:[#allocation3] sm:$0xff] (!%p887_p9) }
 0x46e   : > { %623 = vst [vmem:[#allocation3 + $0x20] sm:$0xff] %v607_v34  ;;  %v608_v39 = vadd.f32 %v592_v36, %v521_v38  ;;  %v646_v16 = vld [vmem:[#allocation3 + $0x18] sm:$0xff] (!%p887_p9) }
 0x46f   : > { %626 = vst [vmem:[#allocation3 + $0x38] sm:$0xff] %v610_v37  ;;  %v639_v10 = vld [vmem:[#allocation3 + $0x8] sm:$0x1] (!%p887_p9) }
 0x470   : > { %624 = vst [vmem:[#allocation3 + $0x28] sm:$0xff] %v608_v39  ;;  %1122 = vrcp.f32 (!%p887_p9), %v639_v10  ;;  %vm640_vm6 = vcmp.gt.f32.partialorder (!%p887_p9), %v639_v10, 0.0  ;;  %v644_v13 = vld [vmem:[#allocation3 + $0x8] sm:$0xff] (!%p887_p9) }
 0x472   : > { %v1027_v46 = vpop.f32.mrb[8].mxu1 }
 0x473   : > { %v613_v48 = vadd.f32 %v1027_v46, %v597_v43  ;;  %v534_v49 = vpop.f32.mrb[9].mxu1 }
 0x474   : > { %v611_v51 = vadd.f32 %v595_v47, %v534_v49  ;;  %v1028_v53 = vpop.f32.mrb[10].mxu1  ;;  %v649_v19 = vld [vmem:[#allocation3 + $0x30] sm:$0xff] (!%p887_p9) }
 0x475   : > { %629 = vst [vmem:[#allocation3 + $0x50] sm:$0xff] %v613_v48  ;;  %v614_v55 = vadd.f32 %v1028_v53, %v598_v50  ;;  %v537_v56 = vpop.f32.mrb[11].mxu1  ;;  %v647_v52 = vld [vmem:[#allocation3 + $0x20] sm:$0xff] (!%p887_p9) }
 0x476   : > { %627 = vst [vmem:[#allocation3 + $0x40] sm:$0xff] %v611_v51  ;;  %v612_v57 = vadd.f32 %v596_v54, %v537_v56  ;;  %v650_v20 = vld [vmem:[#allocation3 + $0x38] sm:$0xff] (!%p887_p9) }
 0x477   : > { %630 = vst [vmem:[#allocation3 + $0x58] sm:$0xff] %v614_v55  ;;  %v648_v18 = vld [vmem:[#allocation3 + $0x28] sm:$0xff] (!%p887_p9) }
 0x478   : > { %628 = vst [vmem:[#allocation3 + $0x48] sm:$0xff] %v612_v57 }
 0x47a   : > { %v1031_v63 = vpop.f32.mrb[12].mxu1  ;;  %638 = sbr.rel (%p887_p9) target bundleno = 1165 (0x48d), region = 52  ;;  %v1123_v11 = vpop.eup (!%p887_p9), %1122 }
 0x47b   : > { %v617_v1 = vadd.f32 %v1031_v63, %v601_v61  ;;  %v550_v2 = vpop.f32.mrb[13].mxu1  ;;  %v642_v14 = vsel (!%p887_p9), %vm640_vm6, %v1123_v11, 0.0 }
 0x47c   : > { %v615_v4 = vadd.f32 %v599_v0, %v550_v2  ;;  %v1032_v5 = vpop.f32.mrb[14].mxu1  ;;  %v662_v17 = vrot.slane (!%p887_p9), %v642_v14, %v1514_v44  ;;  %v653_v27 = vld [vmem:[#allocation3 + $0x50] sm:$0xff] (!%p887_p9) }
 0x47d   : > { %633 = vst [vmem:[#allocation3 + $0x70] sm:$0xff] %v617_v1  ;;  %v618_v7 = vadd.f32 %v1032_v5, %v602_v3  ;;  %v553_v8 = vpop.f32.mrb[15].mxu1  ;;  %v651_v21 = vld [vmem:[#allocation3 + $0x40] sm:$0xff] (!%p887_p9) }
 0x47e   : > { %631 = vst [vmem:[#allocation3 + $0x60] sm:$0xff] %v615_v4  ;;  %v616_v9 = vadd.f32 %v600_v6, %v553_v8  ;;  %v663_v23 = vmul.f32 (!%p887_p9), %v662_v17, %v643_v12  ;;  %v664_v24 = vmul.f32 (!%p887_p9), %v662_v17, %v644_v13  ;;  %v665_v25 = vmul.f32 (!%p887_p9), %v662_v17, %v645_v15  ;;  %v654_v28 = vld [vmem:[#allocation3 + $0x58] sm:$0xff] (!%p887_p9) }
 0x47f   : > { %634 = vst [vmem:[#allocation3 + $0x78] sm:$0xff] %v618_v7  ;;  %v652_v22 = vld [vmem:[#allocation3 + $0x48] sm:$0xff] (!%p887_p9)  ;;  %v666_v26 = vmul.f32 (!%p887_p9), %v662_v17, %v646_v16  ;;  %v667_v29 = vmul.f32 (!%p887_p9), %v662_v17, %v647_v52  ;;  %v668_v30 = vmul.f32 (!%p887_p9), %v662_v17, %v648_v18  ;;  %v669_v31 = vmul.f32 (!%p887_p9), %v662_v17, %v649_v19 }
 0x480   : > { %632 = vst [vmem:[#allocation3 + $0x68] sm:$0xff] %v616_v9  ;;  %v670_v32 = vmul.f32 (!%p887_p9), %v662_v17, %v650_v20  ;;  %v933_v36 = vpack.c.bf16 (!%p887_p9), %v664_v24, %v663_v23  ;;  %v671_v37 = vmul.f32 (!%p887_p9), %v662_v17, %v651_v21  ;;  %v672_v38 = vmul.f32 (!%p887_p9), %v662_v17, %v652_v22 }
 0x481   : > { %v938_v44 = vpack.c.bf16 %v666_v26, %v665_v25  ;;  %v943_v40 = vpack.c.bf16 %v668_v30, %v667_v29  ;;  %v673_v42 = vmul.f32 %v662_v17, %v653_v27  ;;  %v674_v43 = vmul.f32 %v662_v17, %v654_v28 }
 0x482   : > { %v948_v41 = vpack.c.bf16 %v670_v32, %v669_v31  ;;  %934 = vst [vmem:[#allocation10] sm:$0xff] %v933_v36   ;;  %v953_v45 = vpack.c.bf16 %v672_v38, %v671_v37 }
 0x483   : > { %970 = vst [vmem:[#allocation10 + $0x8] sm:$0xff] %v938_v44   ;;  %971 = vst [vmem:[#allocation10 + $0x10] sm:$0xff] %v943_v40   ;;  %v958_v49 = vpack.c.bf16 %v674_v43, %v673_v42 }
 0x484   : > { %v657_v35 = vld [vmem:[#allocation3 + $0x70] sm:$0xff]  ;;  %972 = vst [vmem:[#allocation10 + $0x18] sm:$0xff] %v948_v41   ;;  %973 = vst [vmem:[#allocation10 + $0x20] sm:$0xff] %v953_v45  }
 0x485   : > { %v655_v33 = vld [vmem:[#allocation3 + $0x60] sm:$0xff]  ;;  %v677_v48 = vmul.f32 %v662_v17, %v657_v35  ;;  %974 = vst [vmem:[#allocation10 + $0x28] sm:$0xff] %v958_v49  }
 0x486   : > { %v658_v39 = vld [vmem:[#allocation3 + $0x78] sm:$0xff]  ;;  %v675_v46 = vmul.f32 %v662_v17, %v655_v33 }
 0x487   : > { %v656_v34 = vld [vmem:[#allocation3 + $0x68] sm:$0xff]  ;;  %v678_v50 = vmul.f32 %v662_v17, %v658_v39 }
 0x488   : > { %v676_v47 = vmul.f32 %v662_v17, %v656_v34 }
 0x489   : > { %v968_v53 = vpack.c.bf16 %v678_v50, %v677_v48 }
 0x48a   : > { %v963_v51 = vpack.c.bf16 %v676_v47, %v675_v46 }
 0x48b   : > { %976 = vst [vmem:[#allocation10 + $0x38] sm:$0xff] %v968_v53  }
 0x48c   : > { %975 = vst [vmem:[#allocation10 + $0x30] sm:$0xff] %v963_v51  }
 0x48d PF: > { %p1059_p10 = scmp.eq.s32.totalorder %s1341_s16, 2  ;;  %s1299_s17 = smov [#allocation10]  }
 0x48e   : > { %s765_s18 = sshll.u32 %s1299_s17, 4  ;;  %s766_s18 = int_to_ptr.vmem [resolvable:$true] %s765_s18 }
 0x48f   : > { %s1212_s19 = scalar_lea.vmem %s766_s18, 1024  ;;  %p1219_p13 = scmp.lt.s32.totalorder %s766_s18, %s766_s18 }
 0x490   : > { %p1213_p12 = scmp.ne.s32.totalorder %s766_s18, %s1212_s19  ;;  %p1220_p3 = scmp.lt.s32.totalorder %s1212_s19, %s1212_s19 }
 0x492   : > { %p1214_p0 = pnand %p1213_p12, %p1059_p10  ;;  %p1221_p1 = por %p1220_p3, %p1219_p13 }
 0x494   : > { %p1215_p2 = pneg %p1214_p0 }
 0x496   : > { %p1222_p4 = pnand %p1221_p1, %p1215_p2 }
 0x498   : > { %1225 = shalt.err (!%p1222_p4)
}
 0x499   : > { %s1226_s11 = scalar_lea.hbm %s1585_s3, 1024 }
 0x49a   : > { %p1227_p11 = scmp.ne.s32.totalorder %s1585_s3, %s1226_s11  ;;  %p1232_p5 = scmp.lt.u32.totalorder %s1226_s11, %s1585_s3 }
 0x49c   : > { %p1228_p7 = pnand %p1227_p11, %p1059_p10 }
 0x49e   : > { %p1229_p8 = pneg %p1228_p7 }
 0x4a0   : > { %p1234_p6 = pnand %p1232_p5, %p1229_p8 }
 0x4a2   : > { %1237 = shalt.err (!%p1234_p6)
}
 0x4a3   : > { %s1300_s28 = smov 64   ;;  %s1301_s29 = smov 4  }
 0x4a4   : > { %1042 = dma.vmem_to_hbm [thread:$0]  (%p1059_p10), %s766_s18, 1024, %s1585_s3, [#allocation6], %s1300_s28, %s1300_s28, %s1301_s29  }
 0x4a5   : > { %1267 = dma.done.wait (%p1059_p10), [#allocation6], 1024  }
 0x4a6   : > { %1269 = vsyncadd (%p1059_p10), [#allocation6], 4294966272 }
 0x4a7 PF: > { %p17_p9 = scmp.ge.s32.totalorder %s1367_s22, 5   ;;  %s1598_s12 = smov %s1276_s13 }
 0x4a8   : > { %s1599_s13 = smov %s1280_s14  ;;  %s1600_s14 = smov %s1396_s10 }
 0x4a9   : > { %s1601_s15 = smov %s1367_s22  ;;  %19 = sbr.rel (!%p17_p9) target bundleno = 6 (0x6), region = 94 }
 0x4b0   :  { %781 = vsyncpa [#allocation5], 1 }
 0x4b1   :  { %783 = vsyncpa [#allocation5 + $0x1], 1 }
 0x4b2   :  { %784 = vsyncpa [#allocation8], 1 }
 0x4b3   :  { %786 = vsyncpa [#allocation8 + $0x1], 1 }
 0x4b4   :  { %787 = vsyncpa [#allocation6], 1 }
 0x4b5   :  { %789 = vsyncpa [#allocation6 + $0x1], 1 }

</bundles_post_ra>
